<compile_context>
chip_gen: v7x
topology: tpu7x:2x2x1
jax: 0.10.0
libtpu: 0.0.40
codegen_flags: <defaults>
</compile_context>

<pallas_src>
import functools
import jax
import jax.numpy as jnp
from jax import lax
from jax.experimental import pallas as pl
from jax.experimental.pallas import tpu as pltpu


# ----------------------------------------------------------------------------- Pallas kernels
def _linear_kernel(x_ref, w_ref, b_ref, o_ref):
    x = x_ref[...].astype(jnp.bfloat16)
    w = w_ref[...].astype(jnp.bfloat16)
    o_ref[...] = jnp.dot(x, w, preferred_element_type=jnp.float32) + b_ref[...]


def pallas_linear(x, w, b):
    # x: (M, K)  w: (K, N)  b: (N,)   -> (M, N) f32
    M, K = x.shape
    N = w.shape[1]
    return pl.pallas_call(
        _linear_kernel,
        grid=(1,),
        out_shape=jax.ShapeDtypeStruct((M, N), jnp.float32),
        in_specs=[
            pl.BlockSpec((M, K), lambda i: (0, 0)),
            pl.BlockSpec((K, N), lambda i: (0, 0)),
            pl.BlockSpec((1, N), lambda i: (0, 0)),
        ],
        out_specs=pl.BlockSpec((M, N), lambda i: (0, 0)),
    )(x, w, b.reshape(1, N))


def _layernorm(y, g, b):
    mu = jnp.mean(y, axis=-1, keepdims=True)
    var = jnp.mean((y - mu) ** 2, axis=-1, keepdims=True)
    return (y - mu) * lax.rsqrt(var + 1e-5) * g + b


def _add_ln_kernel(x_ref, r_ref, g_ref, b_ref, o_ref):
    # LN(x + r) fused (residual add never hits HBM separately)
    o_ref[...] = _layernorm(x_ref[...] + r_ref[...], g_ref[...], b_ref[...])


def pallas_add_ln(x, r, g, b):
    M, D = x.shape
    return pl.pallas_call(
        _add_ln_kernel,
        grid=(1,),
        out_shape=jax.ShapeDtypeStruct((M, D), jnp.float32),
        in_specs=[
            pl.BlockSpec((M, D), lambda i: (0, 0)),
            pl.BlockSpec((M, D), lambda i: (0, 0)),
            pl.BlockSpec((1, D), lambda i: (0, 0)),
            pl.BlockSpec((1, D), lambda i: (0, 0)),
        ],
        out_specs=pl.BlockSpec((M, D), lambda i: (0, 0)),
    )(x, r, g.reshape(1, D), b.reshape(1, D))


def _ffn_ln_kernel(x_ref, w1_ref, b1_ref, w2_ref, b2_ref, g_ref, b_ref, o_ref):
    # LN(x + W2(relu(W1 x + b1)) + b2), (M, F) intermediate stays in VMEM.
    x = x_ref[...]
    h = jnp.dot(x.astype(jnp.bfloat16), w1_ref[...].astype(jnp.bfloat16),
                preferred_element_type=jnp.float32) + b1_ref[...]
    h = jnp.maximum(h, 0.0)
    f = jnp.dot(h.astype(jnp.bfloat16), w2_ref[...].astype(jnp.bfloat16),
                preferred_element_type=jnp.float32) + b2_ref[...]
    o_ref[...] = _layernorm(x + f, g_ref[...], b_ref[...])


def pallas_ffn_ln(x, w1, b1, w2, b2, g, b):
    M, D = x.shape
    F = w1.shape[1]
    return pl.pallas_call(
        _ffn_ln_kernel,
        grid=(1,),
        out_shape=jax.ShapeDtypeStruct((M, D), jnp.float32),
        in_specs=[
            pl.BlockSpec((M, D), lambda i: (0, 0)),
            pl.BlockSpec((D, F), lambda i: (0, 0)),
            pl.BlockSpec((1, F), lambda i: (0, 0)),
            pl.BlockSpec((F, D), lambda i: (0, 0)),
            pl.BlockSpec((1, D), lambda i: (0, 0)),
            pl.BlockSpec((1, D), lambda i: (0, 0)),
            pl.BlockSpec((1, D), lambda i: (0, 0)),
        ],
        out_specs=pl.BlockSpec((M, D), lambda i: (0, 0)),
    )(x, w1, b1.reshape(1, F), w2, b2.reshape(1, D), g.reshape(1, D), b.reshape(1, D))


def _mha_core(q, k, v, bias, wo_ref, bo_ref, nheads, scale):
    # q: (S, D)  k/v: (L, D)  bias: None or (1|S, L)   -> (S, D) f32
    D = q.shape[-1]
    Dh = D // nheads
    outs = []
    for h in range(nheads):
        qh = q[:, h * Dh:(h + 1) * Dh].astype(jnp.bfloat16)
        kh = k[:, h * Dh:(h + 1) * Dh].astype(jnp.bfloat16)
        vh = v[:, h * Dh:(h + 1) * Dh].astype(jnp.bfloat16)
        s = lax.dot_general(qh, kh, (((1,), (1,)), ((), ())),
                            preferred_element_type=jnp.float32) * scale
        if bias is not None:
            s = s + bias
        m = jnp.max(s, axis=-1, keepdims=True)
        p = jnp.exp(s - m)
        inv = pl.reciprocal(jnp.sum(p, axis=-1, keepdims=True), approx=True)
        p = (p * inv).astype(jnp.bfloat16)
        outs.append(jnp.dot(p, vh, preferred_element_type=jnp.float32))
    ctx = jnp.concatenate(outs, axis=-1).astype(jnp.bfloat16)   # lane-dense (S, D)
    return jnp.dot(ctx, wo_ref[...].astype(jnp.bfloat16),
                   preferred_element_type=jnp.float32) + bo_ref[...]


def _mha_self_kernel(*refs, nheads, scale, has_bias):
    if has_bias:
        qkv_ref, bias_ref, wo_ref, bo_ref, o_ref = refs
        bias = bias_ref[0]
    else:
        qkv_ref, wo_ref, bo_ref, o_ref = refs
        bias = None
    qkv = qkv_ref[0]                       # (S, 3D) packed, sliced in-register
    D = qkv.shape[-1] // 3
    q, k, v = qkv[:, :D], qkv[:, D:2 * D], qkv[:, 2 * D:]
    o_ref[0] = _mha_core(q, k, v, bias, wo_ref, bo_ref, nheads, scale)


def _mha_cross_kernel(*refs, nheads, scale, has_bias):
    if has_bias:
        q_ref, kv_ref, bias_ref, wo_ref, bo_ref, o_ref = refs
        bias = bias_ref[0]
    else:
        q_ref, kv_ref, wo_ref, bo_ref, o_ref = refs
        bias = None
    q = q_ref[0]                           # (S, D)
    kv = kv_ref[0]                         # (L, 2D) packed
    D = q.shape[-1]
    k, v = kv[:, :D], kv[:, D:]
    o_ref[0] = _mha_core(q, k, v, bias, wo_ref, bo_ref, nheads, scale)


def _mha_call(kernel_fn, primary_args, primary_specs, bias, wo, bo, B, S, D, num_heads):
    scale = 1.0 / float(D // num_heads) ** 0.5
    in_specs = list(primary_specs)
    args = list(primary_args)
    has_bias = bias is not None
    if has_bias:
        Bb, Sb, Lb = bias.shape
        if Bb == B:
            in_specs.append(pl.BlockSpec((1, Sb, Lb), lambda i: (i, 0, 0)))
        else:
            in_specs.append(pl.BlockSpec((1, Sb, Lb), lambda i: (0, 0, 0)))
        args.append(bias)
    in_specs += [pl.BlockSpec((D, D), lambda i: (0, 0)),
                 pl.BlockSpec((1, D), lambda i: (0, 0))]
    args += [wo, bo.reshape(1, D)]
    return pl.pallas_call(
        functools.partial(kernel_fn, nheads=num_heads, scale=scale, has_bias=has_bias),
        grid=(B,),
        out_shape=jax.ShapeDtypeStruct((B, S, D), jnp.float32),
        in_specs=in_specs,
        out_specs=pl.BlockSpec((1, S, D), lambda i: (i, 0, 0)),
        compiler_params=pltpu.CompilerParams(dimension_semantics=("parallel",)),
    )(*args)


def pallas_mha_self(qkv, wo, bo, bias, num_heads):
    # qkv: (B, S, 3D) packed ; bias: None or (B|1, 1|S, S)
    B, S, D3 = qkv.shape
    D = D3 // 3
    specs = [pl.BlockSpec((1, S, D3), lambda i: (i, 0, 0))]
    return _mha_call(_mha_self_kernel, [qkv], specs, bias, wo, bo, B, S, D, num_heads)


def pallas_mha_cross(q, kv, wo, bo, bias, num_heads):
    # q: (B, S, D) ; kv: (B, L, 2D) packed ; bias: None or (B|1, 1|S, L)
    B, S, D = q.shape
    L = kv.shape[1]
    specs = [pl.BlockSpec((1, S, D), lambda i: (i, 0, 0)),
             pl.BlockSpec((1, L, 2 * D), lambda i: (i, 0, 0))]
    return _mha_call(_mha_cross_kernel, [q, kv], specs, bias, wo, bo, B, S, D, num_heads)


def _vocab_kernel(x_ref, e_ref, b_ref, o_ref):
    # x @ emb^T via contraction on emb dim 1 -> no HBM transpose of the tied weight.
    o_ref[...] = lax.dot_general(
        x_ref[...].astype(jnp.bfloat16), e_ref[...].astype(jnp.bfloat16),
        (((1,), (1,)), ((), ())), preferred_element_type=jnp.float32) + b_ref[...]


def pallas_vocab_proj(x, emb, b, tile_n=128):
    # x: (S, D)  emb: (V, D) tied embedding  b: (V,)   -> (S, V)
    S, D = x.shape
    V = emb.shape[0]
    if V % tile_n != 0:
        tile_n = V
    return pl.pallas_call(
        _vocab_kernel,
        grid=(V // tile_n,),
        out_shape=jax.ShapeDtypeStruct((S, V), jnp.float32),
        in_specs=[
            pl.BlockSpec((S, D), lambda i: (0, 0)),
            pl.BlockSpec((tile_n, D), lambda i: (i, 0)),
            pl.BlockSpec((1, tile_n), lambda i: (0, i)),
        ],
        out_specs=pl.BlockSpec((S, tile_n), lambda i: (0, i)),
        compiler_params=pltpu.CompilerParams(
            dimension_semantics=("parallel",),
            vmem_limit_bytes=32 * 1024 * 1024),
    )(x, emb, b.reshape(1, V))


# ----------------------------------------------------------------------------- model pieces
def encoder_layer(x, bias, p, H):
    # x: (B, S, D) ; bias: None or (B|1, 1|S, S) additive key mask
    B, S, D = x.shape
    qkv = pallas_linear(x.reshape(B * S, D), p["attn"]["wqkv"], p["attn"]["bqkv"])
    a = pallas_mha_self(qkv.reshape(B, S, 3 * D), p["attn"]["wo"], p["attn"]["bo"], bias, H)
    x = pallas_add_ln(x.reshape(B * S, D), a.reshape(B * S, D),
                      p["ln1_g"], p["ln1_b"])
    x = pallas_ffn_ln(x, p["w1"], p["b1"], p["w2"], p["b2"], p["ln2_g"], p["ln2_b"])
    return x.reshape(B, S, D)


def decoder_layer(x, word_mem, turn_mem, bias_self, p, H):
    B, S, D = x.shape

    # masked self-attention
    qkv = pallas_linear(x.reshape(B * S, D), p["self_attn"]["wqkv"], p["self_attn"]["bqkv"])
    a = pallas_mha_self(qkv.reshape(B, S, 3 * D), p["self_attn"]["wo"], p["self_attn"]["bo"],
                        bias_self, H)
    x2 = pallas_add_ln(x.reshape(B * S, D), a.reshape(B * S, D), p["ln1_g"], p["ln1_b"])

    # cross-attention on word-level memory (no mask)
    Lw = word_mem.shape[1]
    q = pallas_linear(x2, p["word_attn"]["wq"], p["word_attn"]["bq"]).reshape(B, S, D)
    kv = pallas_linear(word_mem.reshape(B * Lw, D),
                       p["word_attn"]["wkv"], p["word_attn"]["bkv"]).reshape(B, Lw, 2 * D)
    a = pallas_mha_cross(q, kv, p["word_attn"]["wo"], p["word_attn"]["bo"], None, H)
    x3 = pallas_add_ln(x2, a.reshape(B * S, D), p["ln2_g"], p["ln2_b"])

    # cross-attention on turn-level memory (no mask)
    Lt = turn_mem.shape[1]
    q = pallas_linear(x3, p["turn_attn"]["wq"], p["turn_attn"]["bq"]).reshape(B, S, D)
    kv = pallas_linear(turn_mem.reshape(B * Lt, D),
                       p["turn_attn"]["wkv"], p["turn_attn"]["bkv"]).reshape(B, Lt, 2 * D)
    a = pallas_mha_cross(q, kv, p["turn_attn"]["wo"], p["turn_attn"]["bo"], None, H)
    x4 = pallas_add_ln(x3, a.reshape(B * S, D), p["ln3_g"], p["ln3_b"])

    # FFN + residual + LN
    x5 = pallas_ffn_ln(x4, p["w1"], p["b1"], p["w2"], p["b2"], p["ln4_g"], p["ln4_b"])
    return x5.reshape(B, S, D)


def positional_encoding(n, d):
    pos = jnp.arange(n, dtype=jnp.float32)[:, None]
    i = jnp.arange(d, dtype=jnp.float32)[None, :]
    angle = pos / jnp.power(10000.0, (2.0 * jnp.floor(i / 2.0)) / d)
    pe = jnp.where(jnp.mod(jnp.arange(d), 2) == 0, jnp.sin(angle), jnp.cos(angle))
    return pe.astype(jnp.float32)


def summarization_forward(params, inputs, targets, src_masks, hp):
    """inputs: (1, T, L) int32 ; targets: (1, S) int32 ; src_masks: (1, T, L) float (1=valid)."""
    D, H = hp["d_model"], hp["num_heads"]
    inputs = inputs[0]          # squeeze(0) -> (T, L)
    src_masks = src_masks[0]    # squeeze(0) -> (T, L)
    T, L = inputs.shape
    emb = params["embedding"]   # (V, D)  (tied with final_linear.weight)

    # TODO(synk): spaCy/GloVe pretrained embedding load replaced by synthetic weights.
    # --- word-level encoder (batch = T turns); key-mask bias (T, 1, L), broadcast in-kernel ---
    x = emb[inputs] + positional_encoding(L, D)[None]                 # (T, L, D)
    bias_word = jnp.where(src_masks > 0, 0.0, -1e9)[:, None, :]       # (T, 1, L)
    for layer in params["word_enc"]:
        x = encoder_layer(x, bias_word, layer, H)
    word_level_outputs = x                                            # (T, L, D)

    # --- turn-level encoder over the first token of each turn (no mask -> no bias tensor) ---
    turn_in = word_level_outputs[:, 0][None] + positional_encoding(T, D)[None]   # (1, T, D)
    y = turn_in
    for layer in params["turn_enc"]:
        y = encoder_layer(y, None, layer, H)
    turn_level_outputs = y                                            # (1, T, D)

    # --- decoder with causal self-attn + cross-attn on word & turn memories ---
    S = targets.shape[1]
    t = emb[targets] + positional_encoding(S, D)[None]                # (1, S, D)
    word_mem = word_level_outputs.reshape(1, T * L, D)                # reshape(T*L, D).unsqueeze(0)
    causal = jnp.where(jnp.tril(jnp.ones((S, S), jnp.float32)) > 0, 0.0, -1e9)[None]  # (1, S, S)
    d = t
    for layer in params["decoder"]:
        d = decoder_layer(d, word_mem, turn_level_outputs, causal, layer, H)

    # --- final linear (weight tied to embedding, no transpose) + flatten to (B*S, V) ---
    logits = pallas_vocab_proj(d.reshape(S, D), params["embedding"], params["final_b"])
    return logits                                                     # (1*S, V)


# ----------------------------------------------------------------------------- params
def _init_self_attn(key, d):
    k1, k2 = jax.random.split(key, 2)
    return {"wqkv": 0.02 * jax.random.normal(k1, (d, 3 * d), jnp.float32),
            "bqkv": jnp.zeros((3 * d,), jnp.float32),
            "wo": 0.02 * jax.random.normal(k2, (d, d), jnp.float32),
            "bo": jnp.zeros((d,), jnp.float32)}


def _init_cross_attn(key, d):
    k1, k2, k3 = jax.random.split(key, 3)
    return {"wq": 0.02 * jax.random.normal(k1, (d, d), jnp.float32),
            "bq": jnp.zeros((d,), jnp.float32),
            "wkv": 0.02 * jax.random.normal(k2, (d, 2 * d), jnp.float32),
            "bkv": jnp.zeros((2 * d,), jnp.float32),
            "wo": 0.02 * jax.random.normal(k3, (d, d), jnp.float32),
            "bo": jnp.zeros((d,), jnp.float32)}


def _init_enc_layer(key, d, f):
    k1, k2, k3 = jax.random.split(key, 3)
    return {"attn": _init_self_attn(k1, d),
            "ln1_g": jnp.ones((d,), jnp.float32), "ln1_b": jnp.zeros((d,), jnp.float32),
            "w1": 0.02 * jax.random.normal(k2, (d, f), jnp.float32), "b1": jnp.zeros((f,), jnp.float32),
            "w2": 0.02 * jax.random.normal(k3, (f, d), jnp.float32), "b2": jnp.zeros((d,), jnp.float32),
            "ln2_g": jnp.ones((d,), jnp.float32), "ln2_b": jnp.zeros((d,), jnp.float32)}


def _init_dec_layer(key, d, f):
    k1, k2, k3, k4, k5 = jax.random.split(key, 5)
    return {"self_attn": _init_self_attn(k1, d),
            "word_attn": _init_cross_attn(k2, d),
            "turn_attn": _init_cross_attn(k3, d),
            "ln1_g": jnp.ones((d,), jnp.float32), "ln1_b": jnp.zeros((d,), jnp.float32),
            "ln2_g": jnp.ones((d,), jnp.float32), "ln2_b": jnp.zeros((d,), jnp.float32),
            "ln3_g": jnp.ones((d,), jnp.float32), "ln3_b": jnp.zeros((d,), jnp.float32),
            "w1": 0.02 * jax.random.normal(k4, (d, f), jnp.float32), "b1": jnp.zeros((f,), jnp.float32),
            "w2": 0.02 * jax.random.normal(k5, (f, d), jnp.float32), "b2": jnp.zeros((d,), jnp.float32),
            "ln4_g": jnp.ones((d,), jnp.float32), "ln4_b": jnp.zeros((d,), jnp.float32)}


def init_params(key, vocab_size, d_model, filter_size, num_layers):
    k_emb, k_we, k_te, k_de = jax.random.split(key, 4)
    word_keys = jax.random.split(k_we, num_layers)
    turn_keys = jax.random.split(k_te, num_layers)
    dec_keys = jax.random.split(k_de, num_layers)
    return {
        "embedding": 0.02 * jax.random.normal(k_emb, (vocab_size, d_model), jnp.float32),
        "word_enc": [_init_enc_layer(k, d_model, filter_size) for k in word_keys],
        "turn_enc": [_init_enc_layer(k, d_model, filter_size) for k in turn_keys],
        "decoder": [_init_dec_layer(k, d_model, filter_size) for k in dec_keys],
        "final_b": jnp.zeros((vocab_size,), jnp.float32),
    }


# ----------------------------------------------------------------------------- main
if __name__ == "__main__":
    hp = {"d_model": 128, "num_heads": 4, "filter_size": 256, "num_layers": 2,
          "vocab_size": 256}
    assert hp["d_model"] % hp["num_heads"] == 0
    T, L, S = 4, 16, 8            # num_turns, padded_seq_len, target seq_len (batch = 1)

    key = jax.random.PRNGKey(0)
    k_param, k_in, k_tgt, k_len = jax.random.split(key, 4)
    params = init_params(jax.random.PRNGKey(2), hp["vocab_size"], hp["d_model"],
                         hp["filter_size"], hp["num_layers"])

    inputs = jax.random.randint(k_in, (1, T, L), 0, hp["vocab_size"], dtype=jnp.int32)
    targets = jax.random.randint(k_tgt, (1, S), 0, hp["vocab_size"], dtype=jnp.int32)
    lengths = jax.random.randint(k_len, (T,), L // 2, L + 1, dtype=jnp.int32)
    src_masks = (jnp.arange(L)[None, :] < lengths[:, None]).astype(jnp.float32)[None]  # (1, T, L)

    logits = summarization_forward(params, inputs, targets, src_masks, hp)
    logits = jax.block_until_ready(logits)
    assert logits.shape == (1 * S, hp["vocab_size"])
    assert bool(jnp.all(jnp.isfinite(logits)))
    print("KERNEL_OK")
</pallas_src>

<mosaic_0001>
module attributes {stable_mosaic.version = 11 : i64} {
  func.func @_linear_kernel(%arg0: i32, %arg1: memref<64x128xf32, #tpu.memory_space<vmem>>, %arg2: memref<128x384xf32, #tpu.memory_space<vmem>>, %arg3: memref<1x384xf32, #tpu.memory_space<vmem>>, %arg4: memref<64x384xf32, #tpu.memory_space<vmem>>) attributes {dimension_semantics = [#tpu.dimension_semantics<arbitrary>], iteration_bounds = array<i64: 1>, scalar_prefetch = 0 : i64, scratch_operands = 0 : i64, tpu.core_type = #tpu.core_type<tc>, window_params = [{pipeline_mode = #tpu.pipeline_mode<synchronous>, transform_indices = @transform_0, window_bounds = array<i64: 64, 128>}, {pipeline_mode = #tpu.pipeline_mode<synchronous>, transform_indices = @transform_1, window_bounds = array<i64: 128, 384>}, {pipeline_mode = #tpu.pipeline_mode<synchronous>, transform_indices = @transform_2, window_bounds = array<i64: 1, 384>}, {pipeline_mode = #tpu.pipeline_mode<synchronous>, transform_indices = @transform_3, window_bounds = array<i64: 64, 384>}]} {
    %c0 = arith.constant 0 : index
    %c0_0 = arith.constant 0 : index
    %0 = vector.load %arg1[%c0, %c0_0] : memref<64x128xf32, #tpu.memory_space<vmem>>, vector<64x128xf32>
    %1 = arith.truncf %0 : vector<64x128xf32> to vector<64x128xbf16>
    %c0_1 = arith.constant 0 : index
    %c0_2 = arith.constant 0 : index
    %2 = vector.load %arg2[%c0_1, %c0_2] : memref<128x384xf32, #tpu.memory_space<vmem>>, vector<128x384xf32>
    %3 = arith.truncf %2 : vector<128x384xf32> to vector<128x384xbf16>
    %cst = arith.constant dense<0.000000e+00> : vector<64x384xf32>
    %4 = tpu.matmul %1, %3, %cst {dimension_numbers = #tpu.dot_dimension_numbers<[1], [0], [0], [1], [0, 0, 1, 1], [], []>} : vector<64x128xbf16>, vector<128x384xbf16>, vector<64x384xf32> -> vector<64x384xf32>
    %c0_3 = arith.constant 0 : index
    %c0_4 = arith.constant 0 : index
    %5 = vector.load %arg3[%c0_3, %c0_4] : memref<1x384xf32, #tpu.memory_space<vmem>>, vector<1x384xf32>
    %6 = vector.broadcast %5 : vector<1x384xf32> to vector<64x384xf32>
    %7 = arith.addf %4, %6 : vector<64x384xf32>
    %c0_5 = arith.constant 0 : index
    %c0_6 = arith.constant 0 : index
    %8 = vector.load %arg4[%c0_5, %c0_6] : memref<64x384xf32, #tpu.memory_space<vmem>>, vector<64x384xf32>
    tpu.vector_store %arg4[%c0_5, %c0_6], %7 {strides = array<i32>} : memref<64x384xf32, #tpu.memory_space<vmem>>, vector<64x384xf32>,
    return
  }
  func.func @transform_0(%arg0: i32) -> (i32, i32) {
    %c0_i32 = arith.constant 0 : i32
    %c0_i32_0 = arith.constant 0 : i32
    %c0_i32_1 = arith.constant 0 : i32
    return %c0_i32, %c0_i32_0 : i32, i32
  }
  func.func @transform_1(%arg0: i32) -> (i32, i32) {
    %c0_i32 = arith.constant 0 : i32
    %c0_i32_0 = arith.constant 0 : i32
    %c0_i32_1 = arith.constant 0 : i32
    return %c0_i32, %c0_i32_0 : i32, i32
  }
  func.func @transform_2(%arg0: i32) -> (i32, i32) {
    %c0_i32 = arith.constant 0 : i32
    %c0_i32_0 = arith.constant 0 : i32
    %c0_i32_1 = arith.constant 0 : i32
    return %c0_i32, %c0_i32_0 : i32, i32
  }
  func.func @transform_3(%arg0: i32) -> (i32, i32) {
    %c0_i32 = arith.constant 0 : i32
    %c0_i32_0 = arith.constant 0 : i32
    %c0_i32_1 = arith.constant 0 : i32
    return %c0_i32, %c0_i32_0 : i32, i32
  }
}

</mosaic_0001>

<bundles_post_ra>
// kernel: tpu_custom_call.1
= control target key start
LH: loop header
LB: loop body
LE: loop exit
PB: predicated region body
PF: predicated region fallthrough
CT: control target
= control target key end

     0   :  { %8 = vsyncpa [#allocation3], 0  ;;  %s538_s0 = inlined_call_operand.hbm [shape: f32[64,128], index: 0, kind: input, shape index: {}]   ;;  %s539_s1 = inlined_call_operand.hbm [shape: f32[128,384], index: 1, kind: input, shape index: {}]   ;;  %s540_s2 = inlined_call_operand.vmem [shape: f32[1,384], index: 2, kind: input, shape index: {}]   ;;  %s541_s3 = inlined_call_operand.hbm [shape: f32[64,384], index: 3, kind: output, shape index: {}]  }
   0x1   :  { %9 = vsyncpa [#allocation6], 0 }
   0x2   :  { %10 = vsyncpa [#allocation4], 0  ;;  %s441_s12 = smov [#allocation2]   ;;  %s369_s16 = scalar_lea.hbm %s538_s0, 1024 }
   0x3   :  { %s16_s13 = sshll.u32 %s441_s12, 4  ;;  %p370_p0 = scmp.ne.s32.totalorder %s538_s0, %s369_s16  ;;  %s17_s13 = int_to_ptr.vmem [resolvable:$true] %s16_s13 }
   0x4   :  { %p373_p1 = scmp.lt.u32.totalorder %s369_s16, %s538_s0 }
   0x6   :  { %p375_p2 = pnand %p373_p1, %p370_p0 }
   0x8   :  { %378 = shalt.err (!%p375_p2)
}
   0x9   :  { %s379_s21 = scalar_lea.vmem %s17_s13, 1024  ;;  %p384_p4 = scmp.lt.s32.totalorder %s17_s13, %s17_s13 }
   0xa   :  { %p380_p3 = scmp.ne.s32.totalorder %s17_s13, %s379_s21  ;;  %p385_p5 = scmp.lt.s32.totalorder %s379_s21, %s379_s21 }
   0xc   :  { %p386_p6 = por %p385_p5, %p384_p4 }
   0xe   :  { %p387_p7 = pnand %p386_p6, %p380_p3 }
  0x10   :  { %390 = shalt.err (!%p387_p7)
}
  0x11   :  { %s442_s22 = smov 128   ;;  %s443_s23 = smov 8  }
  0x12   :  { %22 = dma.hbm_to_vmem [thread:$0]  %s538_s0, 1024, %s17_s13, [#allocation3], %s442_s22, %s442_s22, %s443_s23  }
  0x13   :  { %s444_s26 = smov [#allocation5]   ;;  %s391_s30 = scalar_lea.hbm %s539_s1, 6144 }
  0x14   :  { %s28_s27 = sshll.u32 %s444_s26, 4  ;;  %p392_p8 = scmp.ne.s32.totalorder %s539_s1, %s391_s30  ;;  %s29_s27 = int_to_ptr.vmem [resolvable:$true] %s28_s27 }
  0x15   :  { %p395_p9 = scmp.lt.u32.totalorder %s391_s30, %s539_s1 }
  0x17   :  { %p397_p10 = pnand %p395_p9, %p392_p8 }
  0x19   :  { %400 = shalt.err (!%p397_p10)
}
  0x1a   :  { %s401_s8 = scalar_lea.vmem %s29_s27, 6144  ;;  %p406_p12 = scmp.lt.s32.totalorder %s29_s27, %s29_s27 }
  0x1b   :  { %p402_p11 = scmp.ne.s32.totalorder %s29_s27, %s401_s8  ;;  %p407_p13 = scmp.lt.s32.totalorder %s401_s8, %s401_s8 }
  0x1d   :  { %p408_p0 = por %p407_p13, %p406_p12 }
  0x1f   :  { %p409_p1 = pnand %p408_p0, %p402_p11 }
  0x21   :  { %412 = shalt.err (!%p409_p1)
}
  0x22   :  { %s445_s0 = smov 384   ;;  %s446_s9 = smov 24  }
  0x23   :  { %34 = dma.hbm_to_vmem [thread:$0]  %s539_s1, 6144, %s29_s27, [#allocation6], %s445_s0, %s445_s0, %s446_s9  }
  0x24   :  { %435 = dma.done.wait [#allocation3], 1024  }
  0x25   :  { %436 = vsyncadd [#allocation3], 4294966272 }
  0x26   :  { %437 = dma.done.wait [#allocation6], 6144  }
  0x27   :  { %438 = vsyncadd [#allocation6], 4294961152  ;;  %v447_v0 = vmov 0   ;;  %v57_v1 = vld [vmem:[#allocation5 + $0x8] sm:$0xff]  ;;  %v60_v2 = vld [vmem:[#allocation5 + $0x20] sm:$0xff] }
  0x28   :  { %177 = vmatprep.mubr.bf16.mxu0 %v447_v0  ;;  %v56_v3 = vld [vmem:[#allocation5] sm:$0xff]  ;;  %v105_v4 = vpack.c.bf16 %v60_v2, %v57_v1  ;;  %v59_v5 = vld [vmem:[#allocation5 + $0x18] sm:$0xff]  ;;  %v66_v7 = vld [vmem:[#allocation5 + $0x50] sm:$0xff] }
  0x29   :  { %v63_v6 = vld [vmem:[#allocation5 + $0x38] sm:$0xff]  ;;  %v104_v8 = vpack.c.bf16 %v59_v5, %v56_v3  ;;  %v62_v10 = vld [vmem:[#allocation5 + $0x30] sm:$0xff]  ;;  %v65_v11 = vld [vmem:[#allocation5 + $0x48] sm:$0xff] }
  0x2a   :  { %v108_v9 = vpack.c.bf16 %v66_v7, %v63_v6  ;;  %v69_v12 = vld [vmem:[#allocation5 + $0x68] sm:$0xff]  ;;  %145 = vmatprep.subr.bf16.mxu0 %v105_v4  ;;  %v72_v13 = vld [vmem:[#allocation5 + $0x80] sm:$0xff]  ;;  %v107_v14 = vpack.c.bf16 %v65_v11, %v62_v10  ;;  %v71_v17 = vld [vmem:[#allocation5 + $0x78] sm:$0xff] }
  0x2b   :  { %146 = vmatpush1.bf16.msra.mxu0 %v104_v8  ;;  %v68_v15 = vld [vmem:[#allocation5 + $0x60] sm:$0xff]  ;;  %v111_v16 = vpack.c.bf16 %v72_v13, %v69_v12  ;;  %v58_v18 = vld [vmem:[#allocation5 + $0x10] sm:$0xff]  ;;  %v61_v19 = vld [vmem:[#allocation5 + $0x28] sm:$0xff] }
  0x2c   :  { %147 = vmatprep.subr.bf16.mxu0 %v108_v9  ;;  %v75_v20 = vld [vmem:[#allocation5 + $0x98] sm:$0xff]  ;;  %v78_v21 = vld [vmem:[#allocation5 + $0xb0] sm:$0xff]  ;;  %v106_v22 = vpack.c.bf16 %v61_v19, %v58_v18  ;;  %v64_v23 = vld [vmem:[#allocation5 + $0x40] sm:$0xff]  ;;  %v110_v25 = vpack.c.bf16 %v71_v17, %v68_v15 }
  0x2d   :  { %v67_v24 = vld [vmem:[#allocation5 + $0x58] sm:$0xff]  ;;  %v74_v26 = vld [vmem:[#allocation5 + $0x90] sm:$0xff]  ;;  %v114_v28 = vpack.c.bf16 %v78_v21, %v75_v20  ;;  %v77_v29 = vld [vmem:[#allocation5 + $0xa8] sm:$0xff] }
  0x2e   :  { %337 = vmatprep.subr.bf16.mxu1 %v106_v22  ;;  %v109_v27 = vpack.c.bf16 %v67_v24, %v64_v23  ;;  %v70_v30 = vld [vmem:[#allocation5 + $0x70] sm:$0xff]  ;;  %v73_v31 = vld [vmem:[#allocation5 + $0x88] sm:$0xff]  ;;  %v84_v33 = vld [vmem:[#allocation5 + $0xe0] sm:$0xff]  ;;  %v113_v37 = vpack.c.bf16 %v77_v29, %v74_v26 }
  0x2f   :  { %148 = vmatpush1.bf16.msra.mxu0 %v107_v14  ;;  %338 = vmatpush3.bf16.msra.mxu1 %v106_v22  ;;  %v81_v32 = vld [vmem:[#allocation5 + $0xc8] sm:$0xff]  ;;  %v112_v34 = vpack.c.bf16 %v73_v31, %v70_v30  ;;  %v76_v35 = vld [vmem:[#allocation5 + $0xa0] sm:$0xff]  ;;  %v79_v36 = vld [vmem:[#allocation5 + $0xb8] sm:$0xff]  ;;  %v130_v22 = vlaneseq }
  0x30   :  { %149 = vmatprep.subr.bf16.mxu0 %v111_v16  ;;  %339 = vmatprep.subr.bf16.mxu1 %v109_v27  ;;  %v117_v38 = vpack.c.bf16 %v84_v33, %v81_v32  ;;  %v80_v39 = vld [vmem:[#allocation5 + $0xc0] sm:$0xff]  ;;  %v83_v40 = vld [vmem:[#allocation5 + $0xd8] sm:$0xff]  ;;  %v90_v42 = vld [vmem:[#allocation5 + $0x110] sm:$0xff]  ;;  %v115_v43 = vpack.c.bf16 %v79_v36, %v76_v35 }
  0x31   :  { %v87_v41 = vld [vmem:[#allocation5 + $0xf8] sm:$0xff]  ;;  %v44_v44 = vld [vmem:[#allocation2] sm:$0xff]  ;;  %v45_v45 = vld [vmem:[#allocation2 + $0x8] sm:$0xff]  ;;  %v116_v48 = vpack.c.bf16 %v83_v40, %v80_v39  ;;  %v131_v23 = vshrl.u32 %v130_v22, 7 }
  0x32   :  { %v82_v46 = vld [vmem:[#allocation5 + $0xd0] sm:$0xff]  ;;  %v85_v47 = vld [vmem:[#allocation5 + $0xe8] sm:$0xff]  ;;  %v52_v49 = vpack.c.bf16 %v45_v45, %v44_v44  ;;  %v120_v50 = vpack.c.bf16 %v90_v42, %v87_v41  ;;  %v96_v54 = vld [vmem:[#allocation5 + $0x140] sm:$0xff] }
  0x33   :  { %150 = vmatpush1.bf16.msra.mxu0 %v110_v25  ;;  %340 = vmatpush3.bf16.msra.mxu1 %v109_v27  ;;  %v86_v51 = vld [vmem:[#allocation5 + $0xf0] sm:$0xff]  ;;  %v89_v52 = vld [vmem:[#allocation5 + $0x108] sm:$0xff]  ;;  %v118_v55 = vpack.c.bf16 %v85_v47, %v82_v46  ;;  %v88_v56 = vld [vmem:[#allocation5 + $0x100] sm:$0xff]  ;;  %v132_v24 = vsub.s32 0, %v131_v23  ;;  %v136_v26 = vsub.s32 1, %v131_v23  ;;  %v140_v29 = vsub.s32 2, %v131_v23 }
  0x34   :  { %151 = vmatprep.subr.bf16.mxu0 %v114_v28  ;;  %341 = vmatprep.subr.bf16.mxu1 %v112_v34  ;;  %v93_v53 = vld [vmem:[#allocation5 + $0x128] sm:$0xff]  ;;  %v91_v57 = vld [vmem:[#allocation5 + $0x118] sm:$0xff]  ;;  %v119_v58 = vpack.c.bf16 %v89_v52, %v86_v51  ;;  %v92_v60 = vld [vmem:[#allocation5 + $0x120] sm:$0xff] }
  0x35   :  { %353 = vmatprep.mubr.bf16.mxu1 %v52_v49  ;;  %v123_v59 = vpack.c.bf16 %v96_v54, %v93_v53  ;;  %v95_v61 = vld [vmem:[#allocation5 + $0x138] sm:$0xff]  ;;  %v102_v63 = vld [vmem:[#allocation5 + $0x170] sm:$0xff]  ;;  %v121_v1 = vpack.c.bf16 %v91_v57, %v88_v56  ;;  %v97_v3 = vld [vmem:[#allocation5 + $0x148] sm:$0xff] }
  0x36   :  { %v99_v62 = vld [vmem:[#allocation5 + $0x158] sm:$0xff]  ;;  %v94_v2 = vld [vmem:[#allocation5 + $0x130] sm:$0xff]  ;;  %v122_v4 = vpack.c.bf16 %v95_v61, %v92_v60  ;;  %v101_v7 = vld [vmem:[#allocation5 + $0x168] sm:$0xff] }
  0x37   :  { %152 = vmatpush1.bf16.msra.mxu0 %v113_v37  ;;  %342 = vmatpush3.bf16.msra.mxu1 %v112_v34  ;;  %v126_v5 = vpack.c.bf16 %v102_v63, %v99_v62  ;;  %v98_v6 = vld [vmem:[#allocation5 + $0x150] sm:$0xff]  ;;  %v124_v8 = vpack.c.bf16 %v97_v3, %v94_v2  ;;  %v100_v9 = vld [vmem:[#allocation5 + $0x160] sm:$0xff]  ;;  %v103_v10 = vld [vmem:[#allocation5 + $0x178] sm:$0xff] }
  0x38   :  { %153 = vmatprep.subr.bf16.mxu0 %v117_v38  ;;  %343 = vmatprep.subr.bf16.mxu1 %v115_v43  ;;  %v125_v11 = vpack.c.bf16 %v101_v7, %v98_v6  ;;  %v127_v12 = vpack.c.bf16 %v103_v10, %v100_v9  ;;  %v46_v13 = vld [vmem:[#allocation2 + $0x10] sm:$0xff]  ;;  %v47_v14 = vld [vmem:[#allocation2 + $0x18] sm:$0xff]  ;;  %v48_v15 = vld [vmem:[#allocation2 + $0x20] sm:$0xff] }
  0x39   :  { %v49_v16 = vld [vmem:[#allocation2 + $0x28] sm:$0xff]  ;;  %v53_v17 = vpack.c.bf16 %v47_v14, %v46_v13  ;;  %v50_v19 = vld [vmem:[#allocation2 + $0x30] sm:$0xff]  ;;  %v51_v20 = vld [vmem:[#allocation2 + $0x38] sm:$0xff] }
  0x3a   :  { %v54_v18 = vpack.c.bf16 %v49_v16, %v48_v15  ;;  %v55_v21 = vpack.c.bf16 %v51_v20, %v50_v19  ;;  %v128_v25 = vld [vmem:[%s540_s2] sm:$0x7]  ;;  %s448_s2 = smov [#allocation7]  }
  0x3b   :  { %154 = vmatpush1.bf16.msra.mxu0 %v116_v48  ;;  %344 = vmatpush3.bf16.msra.mxu1 %v115_v43  ;;  %v503_v27 = vrot.slane %v128_v25, %v132_v24  ;;  %v505_v28 = vrot.slane %v128_v25, %v136_v26  ;;  %v141_v34 = vrot.slane %v128_v25, %v140_v29  ;;  %s312_s13 = sshll.u32 %s448_s2, 4  ;;  %s313_s13 = int_to_ptr.vmem [resolvable:$true] %s312_s13 }
  0x3c   :  { %155 = vmatprep.subr.bf16.mxu0 %v120_v50  ;;  %345 = vmatprep.subr.bf16.mxu1 %v118_v55  ;;  %s413_s14 = scalar_lea.vmem %s313_s13, 3072  ;;  %p418_p3 = scmp.lt.s32.totalorder %s313_s13, %s313_s13 }
  0x3d   :  { %p414_p2 = scmp.ne.s32.totalorder %s313_s13, %s413_s14  ;;  %p419_p4 = scmp.lt.s32.totalorder %s413_s14, %s413_s14 }
  0x3f   :  { %156 = vmatpush1.bf16.msra.mxu0 %v119_v58  ;;  %346 = vmatpush3.bf16.msra.mxu1 %v118_v55  ;;  %p420_p5 = por %p419_p4, %p418_p3 }
  0x40   :  { %157 = vmatprep.subr.bf16.mxu0 %v123_v59  ;;  %347 = vmatprep.subr.bf16.mxu1 %v121_v1 }
  0x41   :  { %p421_p6 = pnand %p420_p5, %p414_p2 }
  0x43   :  { %158 = vmatpush1.bf16.msra.mxu0 %v122_v4  ;;  %348 = vmatpush3.bf16.msra.mxu1 %v121_v1 }
  0x44   :  { %159 = vmatprep.subr.bf16.mxu0 %v126_v5  ;;  %349 = vmatprep.subr.bf16.mxu1 %v124_v8 }
  0x47   :  { %160 = vmatpush1.bf16.msra.mxu0 %v125_v11  ;;  %350 = vmatpush3.bf16.msra.mxu1 %v124_v8 }
  0x48   :  { %351 = vmatprep.subr.bf16.mxu1 %v127_v12 }
  0x4a   :  { %178 = vmatmul.mubr.bf16.vlgmr.msra.gmra.mrb[0].mxu0 %v52_v49 }
  0x4b   :  { %187 = vmatprep.mubr.bf16.mxu0 %v447_v0  ;;  %352 = vmatpush3.bf16.msra.mxu1 %v127_v12 }
  0x4e   :  { %354 = vmatmul.mubr.bf16.vlgmr.msra.gmra.mrb[0].mxu1 %v53_v17 }
  0x4f   :  { %357 = vmatprep.mubr.bf16.mxu1 %v54_v18 }
  0x52   :  { %188 = vmatmul.mubr.bf16.gmra.mrb[4].mxu0 %v53_v17 }
  0x53   :  { %197 = vmatprep.mubr.bf16.mxu0 %v447_v0 }
  0x56   :  { %358 = vmatmul.mubr.bf16.gmra.mrb[4].mxu1 %v55_v21 }
  0x5a   :  { %198 = vmatmul.mubr.bf16.gmra.mrb[8].mxu0 %v54_v18 }
  0x5b   :  { %207 = vmatprep.mubr.bf16.mxu0 %v447_v0 }
  0x62   :  { %208 = vmatmul.mubr.bf16.gmra.mrb[12].mxu0 %v55_v21 }
 0x11d   :  { %v179_v30 = vpop.f32.mrb[0].mxu0 }
 0x11e   :  { %v180_v31 = vadd.f32 %v179_v30, %v503_v27  ;;  %v181_v32 = vpop.f32.mrb[1].mxu0 }
 0x11f   :  { %v182_v0 = vadd.f32 %v181_v32, %v505_v28  ;;  %v183_v33 = vpop.f32.mrb[2].mxu0 }
 0x120   :  { %283 = vst [vmem:[#allocation7] sm:$0xff] %v180_v31  ;;  %v184_v35 = vadd.f32 %v183_v33, %v503_v27  ;;  %v185_v36 = vpop.f32.mrb[3].mxu0 }
 0x121   :  { %284 = vst [vmem:[#allocation7 + $0x8] sm:$0xff] %v182_v0  ;;  %v186_v37 = vadd.f32 %v185_v36, %v505_v28  ;;  %v355_v38 = vpop.f32.mrb[0].mxu1 }
 0x122   :  { %286 = vst [vmem:[#allocation7 + $0x18] sm:$0xff] %v184_v35  ;;  %v261_v39 = vadd.f32 %v355_v38, %v141_v34  ;;  %v252_v40 = vpop.f32.mrb[1].mxu1 }
 0x123   :  { %287 = vst [vmem:[#allocation7 + $0x20] sm:$0xff] %v186_v37  ;;  %v253_v41 = vadd.f32 %v252_v40, %v141_v34  ;;  %v356_v42 = vpop.f32.mrb[2].mxu1 }
 0x124   :  { %291 = vst [vmem:[#allocation7 + $0x40] sm:$0xff] %v261_v39  ;;  %v264_v44 = vadd.f32 %v356_v42, %v141_v34  ;;  %v255_v45 = vpop.f32.mrb[3].mxu1 }
 0x125   :  { %v189_v43 = vpop.f32.mrb[4].mxu0  ;;  %285 = vst [vmem:[#allocation7 + $0x10] sm:$0xff] %v253_v41  ;;  %v256_v48 = vadd.f32 %v255_v45, %v141_v34 }
 0x126   :  { %v190_v46 = vadd.f32 %v189_v43, %v503_v27  ;;  %v191_v47 = vpop.f32.mrb[5].mxu0  ;;  %294 = vst [vmem:[#allocation7 + $0x58] sm:$0xff] %v264_v44 }
 0x127   :  { %v192_v49 = vadd.f32 %v191_v47, %v505_v28  ;;  %v193_v50 = vpop.f32.mrb[6].mxu0  ;;  %288 = vst [vmem:[#allocation7 + $0x28] sm:$0xff] %v256_v48 }
 0x128   :  { %289 = vst [vmem:[#allocation7 + $0x30] sm:$0xff] %v190_v46  ;;  %v194_v51 = vadd.f32 %v193_v50, %v503_v27  ;;  %v195_v52 = vpop.f32.mrb[7].mxu0 }
 0x129   :  { %290 = vst [vmem:[#allocation7 + $0x38] sm:$0xff] %v192_v49  ;;  %v196_v53 = vadd.f32 %v195_v52, %v505_v28  ;;  %v359_v54 = vpop.f32.mrb[4].mxu1 }
 0x12a   :  { %292 = vst [vmem:[#allocation7 + $0x48] sm:$0xff] %v194_v51  ;;  %v277_v55 = vadd.f32 %v359_v54, %v141_v34  ;;  %v268_v56 = vpop.f32.mrb[5].mxu1 }
 0x12b   :  { %293 = vst [vmem:[#allocation7 + $0x50] sm:$0xff] %v196_v53  ;;  %v269_v57 = vadd.f32 %v268_v56, %v141_v34  ;;  %v360_v58 = vpop.f32.mrb[6].mxu1 }
 0x12c   :  { %303 = vst [vmem:[#allocation7 + $0xa0] sm:$0xff] %v277_v55  ;;  %v280_v60 = vadd.f32 %v360_v58, %v141_v34  ;;  %v271_v61 = vpop.f32.mrb[7].mxu1 }
 0x12d   :  { %v199_v59 = vpop.f32.mrb[8].mxu0  ;;  %297 = vst [vmem:[#allocation7 + $0x70] sm:$0xff] %v269_v57  ;;  %v272_v1 = vadd.f32 %v271_v61, %v141_v34 }
 0x12e   :  { %v200_v62 = vadd.f32 %v199_v59, %v503_v27  ;;  %v201_v63 = vpop.f32.mrb[9].mxu0  ;;  %306 = vst [vmem:[#allocation7 + $0xb8] sm:$0xff] %v280_v60 }
 0x12f   :  { %v202_v2 = vadd.f32 %v201_v63, %v505_v28  ;;  %v203_v3 = vpop.f32.mrb[10].mxu0  ;;  %300 = vst [vmem:[#allocation7 + $0x88] sm:$0xff] %v272_v1 }
 0x130   :  { %295 = vst [vmem:[#allocation7 + $0x60] sm:$0xff] %v200_v62  ;;  %v204_v4 = vadd.f32 %v203_v3, %v503_v27  ;;  %v205_v5 = vpop.f32.mrb[11].mxu0 }
 0x131   :  { %296 = vst [vmem:[#allocation7 + $0x68] sm:$0xff] %v202_v2  ;;  %v206_v6 = vadd.f32 %v205_v5, %v505_v28 }
 0x132   :  { %298 = vst [vmem:[#allocation7 + $0x78] sm:$0xff] %v204_v4 }
 0x133   :  { %299 = vst [vmem:[#allocation7 + $0x80] sm:$0xff] %v206_v6 }
 0x135   :  { %v209_v7 = vpop.f32.mrb[12].mxu0 }
 0x136   :  { %v210_v8 = vadd.f32 %v209_v7, %v503_v27  ;;  %v211_v9 = vpop.f32.mrb[13].mxu0 }
 0x137   :  { %v212_v10 = vadd.f32 %v211_v9, %v505_v28  ;;  %v213_v11 = vpop.f32.mrb[14].mxu0 }
 0x138   :  { %301 = vst [vmem:[#allocation7 + $0x90] sm:$0xff] %v210_v8  ;;  %v214_v12 = vadd.f32 %v213_v11, %v503_v27  ;;  %v215_v13 = vpop.f32.mrb[15].mxu0 }
 0x139   :  { %302 = vst [vmem:[#allocation7 + $0x98] sm:$0xff] %v212_v10  ;;  %v216_v14 = vadd.f32 %v215_v13, %v505_v28 }
 0x13a   :  { %304 = vst [vmem:[#allocation7 + $0xa8] sm:$0xff] %v214_v12 }
 0x13b   :  { %305 = vst [vmem:[#allocation7 + $0xb0] sm:$0xff] %v216_v14 }
 0x13c   :  { %424 = shalt.err (!%p421_p6)
}
 0x13d   :  { %s425_s17 = scalar_lea.hbm %s541_s3, 3072 }
 0x13e   :  { %p426_p7 = scmp.ne.s32.totalorder %s541_s3, %s425_s17  ;;  %p429_p8 = scmp.lt.u32.totalorder %s425_s17, %s541_s3 }
 0x140   :  { %p431_p9 = pnand %p429_p8, %p426_p7 }
 0x142   :  { %434 = shalt.err (!%p431_p9)
}
 0x143   :  { %318 = dma.vmem_to_hbm [thread:$0]  %s313_s13, 3072, %s541_s3, [#allocation4], %s445_s0, %s445_s0, %s446_s9  }
 0x144   :  { %439 = dma.done.wait [#allocation4], 3072  }
 0x145   :  { %440 = vsyncadd [#allocation4], 4294964224 }
 0x146   :  { %322 = vsyncpa [#allocation3], 1 }
 0x147   :  { %323 = vsyncpa [#allocation6], 1 }
 0x148   :  { %324 = vsyncpa [#allocation4], 1 }

</bundles_post_ra>
